<compile_context>
chip_gen: v7x
topology: tpu7x:2x2x1
jax: 0.10.0
libtpu: 0.0.40
codegen_flags: <defaults>
</compile_context>

<pallas_src>
import functools

import jax
import jax.numpy as jnp
import numpy as np
from jax import lax
from jax.experimental import pallas as pl
from jax.experimental.pallas import tpu as pltpu

EPS = 1e-5


def _row_shifts(x, W, h_first, h_last):
    """Reflection-padded row (H-direction) shifted copies of x for dh=-1,0,+1.

    x is (R, H*W) with the flattened spatial index on the lane axis; each
    sublane row is one (sample, channel) plane.  A one-row shift is a
    lane-roll by W; the first/last output rows are fixed up with the reflected
    row (index 1 / H-2) via a select (XLU roll + VPU select).
    """
    HW = x.shape[-1]
    down = pltpu.roll(x, W, 1)       # down[:, p] = x[:, p - W]   (row h-1)
    up = pltpu.roll(x, HW - W, 1)    # up[:, p]   = x[:, p + W]   (row h+1)
    return (
        jnp.where(h_first, up, down),   # dh = -1 : reflect -1 -> 1
        x,                              # dh =  0
        jnp.where(h_last, down, up),    # dh = +1 : reflect H -> H-2
    )


def _col_shifts(x, w_first, w_last):
    """Reflection-padded column (W-direction) shifted copies for dw=-1,0,+1."""
    HW = x.shape[-1]
    right = pltpu.roll(x, 1, 1)      # right[:, p] = x[:, p - 1]  (col w-1)
    left = pltpu.roll(x, HW - 1, 1)  # left[:, p]  = x[:, p + 1]  (col w+1)
    return (
        jnp.where(w_first, left, right),  # dw = -1 : reflect -1 -> 1
        x,                                # dw =  0
        jnp.where(w_last, right, left),   # dw = +1 : reflect W -> W-2
    )


def _conv3x3_instnorm(x, w_ref, masks, W):
    """reflect-pad(1) -> conv3x3 (bias-free) -> InstanceNorm2d(affine=False).

    x: (N*C, HW) f32; w_ref: (N*C, 9*N*C) batch-block-diagonal weight slab.
    The 9 taps are stacked along sublanes (8-aligned blocks, no tile-boundary
    crossing) so the whole conv is ONE MXU matmul.  Returns (N*C, HW) f32.
    """
    NC, HW = x.shape
    h_first, h_last, w_first, w_last = masks

    taps = []
    for xh in _row_shifts(x, W, h_first, h_last):          # dh = -1, 0, +1
        for tap in _col_shifts(xh, w_first, w_last):        # dw = -1, 0, +1
            taps.append(tap)                                # k = (dh+1)*3 + (dw+1)
    slab = jnp.concatenate(taps, axis=0)                    # (9*N*C, HW)

    # (N*C, 9*N*C) @ (9*N*C, HW) on the MXU, f32 accumulation.
    acc = jnp.dot(w_ref[...], slab, preferred_element_type=jnp.float32)

    # One-pass InstanceNorm statistics over the spatial (lane) axis per row.
    inv_hw = 1.0 / HW
    s = jnp.sum(acc, axis=1, keepdims=True)
    s2 = jnp.sum(acc * acc, axis=1, keepdims=True)
    mean = s * inv_hw
    var = jnp.maximum(s2 * inv_hw - mean * mean, 0.0)   # clamp: f32 cancellation
    return (acc - mean) * lax.rsqrt(var + EPS)


def _resnet_block_kernel(x_ref, w1_ref, w2_ref, o_ref, *, H, W):
    x = x_ref[...]                                  # (N*C, H*W), lane-dense
    NC, HW = x.shape

    # Boundary masks for the reflection fix-ups, computed once in-kernel and
    # reused by both convs (no DMA'd index tensor).
    pos = lax.broadcasted_iota(jnp.int32, (NC, HW), 1)
    if (W & (W - 1)) == 0:                          # W power of two -> cheap AND
        col = pos & (W - 1)
    else:
        col = pos % W
    masks = (
        pos < W,               # h == 0
        pos >= (H - 1) * W,    # h == H - 1
        col == 0,              # w == 0
        col == W - 1,          # w == W - 1
    )

    h = jnp.maximum(_conv3x3_instnorm(x, w1_ref, masks, W), 0.0)   # stage 1 + ReLU
    y = _conv3x3_instnorm(h, w2_ref, masks, W)                     # stage 2
    o_ref[...] = x + y                                             # residual


def _block_diag_weight(w, N):
    """(Cout, Cin, 3, 3) conv weight -> (N*C, 9*N*C) batch-block-diag slab.

    Row index = n*C + co; column index = k*(N*C) + m*C + ci with k = kh*3+kw,
    zero unless m == n.  Matches the in-kernel stacked-tap slab layout.
    """
    C = w.shape[0]
    wt = jnp.transpose(w, (0, 2, 3, 1)).reshape(C, 9, C).astype(jnp.float32)
    eye = jnp.eye(N, dtype=jnp.float32)
    return jnp.einsum("nm,okc->nokmc", eye, wt).reshape(N * C, 9 * N * C)


@jax.jit
def resnet_block_forward(x_nchw, w1, b1, w2, b2):
    """x_nchw: (N, C, H, W) f32; w*: (C, C, 3, 3); b*: (C,).

    b1/b2 are accepted for interface parity with the PyTorch module but are
    unused: a conv bias immediately followed by InstanceNorm2d(affine=False)
    is exactly cancelled by the mean subtraction.
    """
    del b1, b2
    N, C, H, W = x_nchw.shape
    HW = H * W
    NC = N * C

    x = x_nchw.reshape(NC, HW).astype(jnp.float32)   # free reshape, stays NCHW
    w1k = _block_diag_weight(w1, N)                  # (N*C, 9*N*C)
    w2k = _block_diag_weight(w2, N)

    kernel = functools.partial(_resnet_block_kernel, H=H, W=W)
    out = pl.pallas_call(
        kernel,
        out_shape=jax.ShapeDtypeStruct((NC, HW), jnp.float32),
        grid_spec=pltpu.PrefetchScalarGridSpec(
            num_scalar_prefetch=0,
            grid=(1,),                               # single block, whole batch
            in_specs=[
                pl.BlockSpec((NC, HW), lambda i: (0, 0)),
                pl.BlockSpec((NC, 9 * NC), lambda i: (0, 0)),
                pl.BlockSpec((NC, 9 * NC), lambda i: (0, 0)),
            ],
            out_specs=pl.BlockSpec((NC, HW), lambda i: (0, 0)),
        ),
        compiler_params=pltpu.CompilerParams(
            dimension_semantics=("arbitrary",)),
    )(x, w1k, w2k)
    return out.reshape(N, C, H, W)


# ----------------------- pure-JAX reference (for checking) -----------------------
def _ref_resnet_block(x, w1, b1, w2, b2):
    def conv(a, w, b):
        ap = jnp.pad(a, ((0, 0), (0, 0), (1, 1), (1, 1)), mode="reflect")
        y = lax.conv_general_dilated(
            ap, w, window_strides=(1, 1), padding="VALID",
            dimension_numbers=("NCHW", "OIHW", "NCHW"))
        return y + b[None, :, None, None]

    def inorm(a):
        m = jnp.mean(a, axis=(2, 3), keepdims=True)
        v = jnp.mean((a - m) ** 2, axis=(2, 3), keepdims=True)
        return (a - m) * lax.rsqrt(v + EPS)

    h = jnp.maximum(inorm(conv(x, w1, b1)), 0.0)
    return x + inorm(conv(h, w2, b2))


if __name__ == "__main__":
    N, C, H, W = 2, 4, 16, 16
    key = jax.random.PRNGKey(0)
    kx, kw1, kb1, kw2, kb2 = jax.random.split(key, 5)

    x = jax.random.normal(kx, (N, C, H, W), dtype=jnp.float32)
    # Deterministic synthetic parameters (Conv2d(dim, dim, 3, bias=True) shapes).
    w1 = jax.random.normal(kw1, (C, C, 3, 3), dtype=jnp.float32) * 0.1
    b1 = jax.random.normal(kb1, (C,), dtype=jnp.float32) * 0.1
    w2 = jax.random.normal(kw2, (C, C, 3, 3), dtype=jnp.float32) * 0.1
    b2 = jax.random.normal(kb2, (C,), dtype=jnp.float32) * 0.1

    out = jax.block_until_ready(resnet_block_forward(x, w1, b1, w2, b2))
    ref = jax.block_until_ready(_ref_resnet_block(x, w1, b1, w2, b2))

    assert out.shape == (N, C, H, W) and out.dtype == jnp.float32
    np.testing.assert_allclose(np.asarray(out), np.asarray(ref),
                               rtol=1e-4, atol=1e-4)
    print("KERNEL_OK")
</pallas_src>

<mosaic_0001>
module attributes {stable_mosaic.version = 11 : i64} {
  func.func @_resnet_block_kernel(%arg0: i32, %arg1: memref<8x256xf32, #tpu.memory_space<vmem>>, %arg2: memref<8x72xf32, #tpu.memory_space<vmem>>, %arg3: memref<8x72xf32, #tpu.memory_space<vmem>>, %arg4: memref<8x256xf32, #tpu.memory_space<vmem>>) attributes {dimension_semantics = [#tpu.dimension_semantics<arbitrary>], iteration_bounds = array<i64: 1>, scalar_prefetch = 0 : i64, scratch_operands = 0 : i64, tpu.core_type = #tpu.core_type<tc>, window_params = [{pipeline_mode = #tpu.pipeline_mode<synchronous>, transform_indices = @transform_0, window_bounds = array<i64: 8, 256>}, {pipeline_mode = #tpu.pipeline_mode<synchronous>, transform_indices = @transform_1, window_bounds = array<i64: 8, 72>}, {pipeline_mode = #tpu.pipeline_mode<synchronous>, transform_indices = @transform_2, window_bounds = array<i64: 8, 72>}, {pipeline_mode = #tpu.pipeline_mode<synchronous>, transform_indices = @transform_3, window_bounds = array<i64: 8, 256>}]} {
    %c0 = arith.constant 0 : index
    %c0_0 = arith.constant 0 : index
    %0 = vector.load %arg1[%c0, %c0_0] : memref<8x256xf32, #tpu.memory_space<vmem>>, vector<8x256xf32>
    %1 = tpu.iota {dimensions = array<i32: 1>} : vector<8x256xi32>
    %c15_i32 = arith.constant 15 : i32
    %2 = vector.broadcast %c15_i32 : i32 to vector<8x256xi32>
    %3 = arith.andi %1, %2 : vector<8x256xi32>
    %c16_i32 = arith.constant 16 : i32
    %4 = vector.broadcast %c16_i32 : i32 to vector<8x256xi32>
    %5 = arith.cmpi slt, %1, %4 : vector<8x256xi32>
    %c240_i32 = arith.constant 240 : i32
    %6 = vector.broadcast %c240_i32 : i32 to vector<8x256xi32>
    %7 = arith.cmpi sge, %1, %6 : vector<8x256xi32>
    %c0_i32 = arith.constant 0 : i32
    %8 = vector.broadcast %c0_i32 : i32 to vector<8x256xi32>
    %9 = arith.cmpi eq, %3, %8 : vector<8x256xi32>
    %c15_i32_1 = arith.constant 15 : i32
    %10 = vector.broadcast %c15_i32_1 : i32 to vector<8x256xi32>
    %11 = arith.cmpi eq, %3, %10 : vector<8x256xi32>
    %c16_i32_2 = arith.constant 16 : i32
    %12 = tpu.dynamic_rotate %0 by %c16_i32_2 dim 1 : vector<8x256xf32>, i32 -> vector<8x256xf32>
    %c240_i32_3 = arith.constant 240 : i32
    %13 = tpu.dynamic_rotate %0 by %c240_i32_3 dim 1 : vector<8x256xf32>, i32 -> vector<8x256xf32>
    %14 = arith.select %5, %13, %12 : vector<8x256xi1>, vector<8x256xf32>
    %15 = arith.select %7, %12, %13 : vector<8x256xi1>, vector<8x256xf32>
    %c1_i32 = arith.constant 1 : i32
    %16 = tpu.dynamic_rotate %14 by %c1_i32 dim 1 : vector<8x256xf32>, i32 -> vector<8x256xf32>
    %c255_i32 = arith.constant 255 : i32
    %17 = tpu.dynamic_rotate %14 by %c255_i32 dim 1 : vector<8x256xf32>, i32 -> vector<8x256xf32>
    %18 = arith.select %9, %17, %16 : vector<8x256xi1>, vector<8x256xf32>
    %19 = arith.select %11, %16, %17 : vector<8x256xi1>, vector<8x256xf32>
    %c1_i32_4 = arith.constant 1 : i32
    %20 = tpu.dynamic_rotate %0 by %c1_i32_4 dim 1 : vector<8x256xf32>, i32 -> vector<8x256xf32>
    %c255_i32_5 = arith.constant 255 : i32
    %21 = tpu.dynamic_rotate %0 by %c255_i32_5 dim 1 : vector<8x256xf32>, i32 -> vector<8x256xf32>
    %22 = arith.select %9, %21, %20 : vector<8x256xi1>, vector<8x256xf32>
    %23 = arith.select %11, %20, %21 : vector<8x256xi1>, vector<8x256xf32>
    %c1_i32_6 = arith.constant 1 : i32
    %24 = tpu.dynamic_rotate %15 by %c1_i32_6 dim 1 : vector<8x256xf32>, i32 -> vector<8x256xf32>
    %c255_i32_7 = arith.constant 255 : i32
    %25 = tpu.dynamic_rotate %15 by %c255_i32_7 dim 1 : vector<8x256xf32>, i32 -> vector<8x256xf32>
    %26 = arith.select %9, %25, %24 : vector<8x256xi1>, vector<8x256xf32>
    %27 = arith.select %11, %24, %25 : vector<8x256xi1>, vector<8x256xf32>
    %28 = tpu.concatenate %18, %14, %19, %22, %0, %23, %26, %15, %27 in 0 : vector<8x256xf32>, vector<8x256xf32>, vector<8x256xf32>, vector<8x256xf32>, vector<8x256xf32>, vector<8x256xf32>, vector<8x256xf32>, vector<8x256xf32>, vector<8x256xf32> -> vector<72x256xf32>
    %c0_8 = arith.constant 0 : index
    %c0_9 = arith.constant 0 : index
    %29 = vector.load %arg2[%c0_8, %c0_9] : memref<8x72xf32, #tpu.memory_space<vmem>>, vector<8x72xf32>
    %cst = arith.constant dense<0.000000e+00> : vector<8x256xf32>
    %30 = tpu.matmul %29, %28, %cst {dimension_numbers = #tpu.dot_dimension_numbers<[1], [0], [0], [1], [0, 0, 1, 1], [], []>} : vector<8x72xf32>, vector<72x256xf32>, vector<8x256xf32> -> vector<8x256xf32>
    %cst_10 = arith.constant dense<0.000000e+00> : vector<8xf32>
    %31 = vector.multi_reduction <add>, %30, %cst_10 [1] : vector<8x256xf32> to vector<8xf32>
    %32 = vector.shape_cast %31 : vector<8xf32> to vector<8x1xf32>
    %33 = arith.mulf %30, %30 : vector<8x256xf32>
    %cst_11 = arith.constant dense<0.000000e+00> : vector<8xf32>
    %34 = vector.multi_reduction <add>, %33, %cst_11 [1] : vector<8x256xf32> to vector<8xf32>
    %35 = vector.shape_cast %34 : vector<8xf32> to vector<8x1xf32>
    %cst_12 = arith.constant 3.906250e-03 : f32
    %36 = vector.broadcast %cst_12 : f32 to vector<8x1xf32>
    %37 = arith.mulf %32, %36 : vector<8x1xf32>
    %cst_13 = arith.constant 3.906250e-03 : f32
    %38 = vector.broadcast %cst_13 : f32 to vector<8x1xf32>
    %39 = arith.mulf %35, %38 : vector<8x1xf32>
    %40 = arith.mulf %37, %37 : vector<8x1xf32>
    %41 = arith.subf %39, %40 : vector<8x1xf32>
    %cst_14 = arith.constant 0.000000e+00 : f32
    %42 = vector.broadcast %cst_14 : f32 to vector<8x1xf32>
    %43 = arith.maximumf %41, %42 : vector<8x1xf32>
    %44 = vector.broadcast %37 : vector<8x1xf32> to vector<8x256xf32>
    %45 = arith.subf %30, %44 : vector<8x256xf32>
    %cst_15 = arith.constant 9.99999974E-6 : f32
    %46 = vector.broadcast %cst_15 : f32 to vector<8x1xf32>
    %47 = arith.addf %43, %46 : vector<8x1xf32>
    %48 = math.rsqrt %47 : vector<8x1xf32>
    %49 = vector.broadcast %48 : vector<8x1xf32> to vector<8x256xf32>
    %50 = arith.mulf %45, %49 : vector<8x256xf32>
    %cst_16 = arith.constant 0.000000e+00 : f32
    %51 = vector.broadcast %cst_16 : f32 to vector<8x256xf32>
    %52 = arith.maximumf %50, %51 : vector<8x256xf32>
    %c16_i32_17 = arith.constant 16 : i32
    %53 = tpu.dynamic_rotate %52 by %c16_i32_17 dim 1 : vector<8x256xf32>, i32 -> vector<8x256xf32>
    %c240_i32_18 = arith.constant 240 : i32
    %54 = tpu.dynamic_rotate %52 by %c240_i32_18 dim 1 : vector<8x256xf32>, i32 -> vector<8x256xf32>
    %55 = arith.select %5, %54, %53 : vector<8x256xi1>, vector<8x256xf32>
    %56 = arith.select %7, %53, %54 : vector<8x256xi1>, vector<8x256xf32>
    %c1_i32_19 = arith.constant 1 : i32
    %57 = tpu.dynamic_rotate %55 by %c1_i32_19 dim 1 : vector<8x256xf32>, i32 -> vector<8x256xf32>
    %c255_i32_20 = arith.constant 255 : i32
    %58 = tpu.dynamic_rotate %55 by %c255_i32_20 dim 1 : vector<8x256xf32>, i32 -> vector<8x256xf32>
    %59 = arith.select %9, %58, %57 : vector<8x256xi1>, vector<8x256xf32>
    %60 = arith.select %11, %57, %58 : vector<8x256xi1>, vector<8x256xf32>
    %c1_i32_21 = arith.constant 1 : i32
    %61 = tpu.dynamic_rotate %52 by %c1_i32_21 dim 1 : vector<8x256xf32>, i32 -> vector<8x256xf32>
    %c255_i32_22 = arith.constant 255 : i32
    %62 = tpu.dynamic_rotate %52 by %c255_i32_22 dim 1 : vector<8x256xf32>, i32 -> vector<8x256xf32>
    %63 = arith.select %9, %62, %61 : vector<8x256xi1>, vector<8x256xf32>
    %64 = arith.select %11, %61, %62 : vector<8x256xi1>, vector<8x256xf32>
    %c1_i32_23 = arith.constant 1 : i32
    %65 = tpu.dynamic_rotate %56 by %c1_i32_23 dim 1 : vector<8x256xf32>, i32 -> vector<8x256xf32>
    %c255_i32_24 = arith.constant 255 : i32
    %66 = tpu.dynamic_rotate %56 by %c255_i32_24 dim 1 : vector<8x256xf32>, i32 -> vector<8x256xf32>
    %67 = arith.select %9, %66, %65 : vector<8x256xi1>, vector<8x256xf32>
    %68 = arith.select %11, %65, %66 : vector<8x256xi1>, vector<8x256xf32>
    %69 = tpu.concatenate %59, %55, %60, %63, %52, %64, %67, %56, %68 in 0 : vector<8x256xf32>, vector<8x256xf32>, vector<8x256xf32>, vector<8x256xf32>, vector<8x256xf32>, vector<8x256xf32>, vector<8x256xf32>, vector<8x256xf32>, vector<8x256xf32> -> vector<72x256xf32>
    %c0_25 = arith.constant 0 : index
    %c0_26 = arith.constant 0 : index
    %70 = vector.load %arg3[%c0_25, %c0_26] : memref<8x72xf32, #tpu.memory_space<vmem>>, vector<8x72xf32>
    %cst_27 = arith.constant dense<0.000000e+00> : vector<8x256xf32>
    %71 = tpu.matmul %70, %69, %cst_27 {dimension_numbers = #tpu.dot_dimension_numbers<[1], [0], [0], [1], [0, 0, 1, 1], [], []>} : vector<8x72xf32>, vector<72x256xf32>, vector<8x256xf32> -> vector<8x256xf32>
    %cst_28 = arith.constant dense<0.000000e+00> : vector<8xf32>
    %72 = vector.multi_reduction <add>, %71, %cst_28 [1] : vector<8x256xf32> to vector<8xf32>
    %73 = vector.shape_cast %72 : vector<8xf32> to vector<8x1xf32>
    %74 = arith.mulf %71, %71 : vector<8x256xf32>
    %cst_29 = arith.constant dense<0.000000e+00> : vector<8xf32>
    %75 = vector.multi_reduction <add>, %74, %cst_29 [1] : vector<8x256xf32> to vector<8xf32>
    %76 = vector.shape_cast %75 : vector<8xf32> to vector<8x1xf32>
    %cst_30 = arith.constant 3.906250e-03 : f32
    %77 = vector.broadcast %cst_30 : f32 to vector<8x1xf32>
    %78 = arith.mulf %73, %77 : vector<8x1xf32>
    %cst_31 = arith.constant 3.906250e-03 : f32
    %79 = vector.broadcast %cst_31 : f32 to vector<8x1xf32>
    %80 = arith.mulf %76, %79 : vector<8x1xf32>
    %81 = arith.mulf %78, %78 : vector<8x1xf32>
    %82 = arith.subf %80, %81 : vector<8x1xf32>
    %cst_32 = arith.constant 0.000000e+00 : f32
    %83 = vector.broadcast %cst_32 : f32 to vector<8x1xf32>
    %84 = arith.maximumf %82, %83 : vector<8x1xf32>
    %85 = vector.broadcast %78 : vector<8x1xf32> to vector<8x256xf32>
    %86 = arith.subf %71, %85 : vector<8x256xf32>
    %cst_33 = arith.constant 9.99999974E-6 : f32
    %87 = vector.broadcast %cst_33 : f32 to vector<8x1xf32>
    %88 = arith.addf %84, %87 : vector<8x1xf32>
    %89 = math.rsqrt %88 : vector<8x1xf32>
    %90 = vector.broadcast %89 : vector<8x1xf32> to vector<8x256xf32>
    %91 = arith.mulf %86, %90 : vector<8x256xf32>
    %92 = arith.addf %0, %91 : vector<8x256xf32>
    %c0_34 = arith.constant 0 : index
    %c0_35 = arith.constant 0 : index
    %93 = vector.load %arg4[%c0_34, %c0_35] : memref<8x256xf32, #tpu.memory_space<vmem>>, vector<8x256xf32>
    tpu.vector_store %arg4[%c0_34, %c0_35], %92 {strides = array<i32>} : memref<8x256xf32, #tpu.memory_space<vmem>>, vector<8x256xf32>,
    return
  }
  func.func @transform_0(%arg0: i32) -> (i32, i32) {
    %c0_i32 = arith.constant 0 : i32
    %c0_i32_0 = arith.constant 0 : i32
    %c0_i32_1 = arith.constant 0 : i32
    return %c0_i32, %c0_i32_0 : i32, i32
  }
  func.func @transform_1(%arg0: i32) -> (i32, i32) {
    %c0_i32 = arith.constant 0 : i32
    %c0_i32_0 = arith.constant 0 : i32
    %c0_i32_1 = arith.constant 0 : i32
    return %c0_i32, %c0_i32_0 : i32, i32
  }
  func.func @transform_2(%arg0: i32) -> (i32, i32) {
    %c0_i32 = arith.constant 0 : i32
    %c0_i32_0 = arith.constant 0 : i32
    %c0_i32_1 = arith.constant 0 : i32
    return %c0_i32, %c0_i32_0 : i32, i32
  }
  func.func @transform_3(%arg0: i32) -> (i32, i32) {
    %c0_i32 = arith.constant 0 : i32
    %c0_i32_0 = arith.constant 0 : i32
    %c0_i32_1 = arith.constant 0 : i32
    return %c0_i32, %c0_i32_0 : i32, i32
  }
}

</mosaic_0001>

<bundles_post_ra>
// kernel: resnet_block_forward.1
= control target key start
LH: loop header
LB: loop body
LE: loop exit
PB: predicated region body
PF: predicated region fallthrough
CT: control target
= control target key end

     0   :  { %s442_s14 = smov 112   ;;  %s443_s15 = smov 16   ;;  %v16_v2 = vlaneseq  ;;  %v446_v17 = vmov 0.0   ;;  %vm97_vm9 = vcmask 588800   ;;  %s702_s0 = inlined_call_operand.vmem [shape: f32[8,256], index: 0, kind: input, shape index: {}]   ;;  %s703_s1 = inlined_call_operand.vmem [shape: f32[8,72], index: 1, kind: input, shape index: {}]   ;;  %s704_s2 = inlined_call_operand.vmem [shape: f32[8,72], index: 2, kind: input, shape index: {}]   ;;  %s705_s3 = inlined_call_operand.vmem [shape: f32[8,256], index: 3, kind: output, shape index: {}]  }
   0x1   :  { %v470_v0 = vld [vmem:[%s702_s0] sm:$0xff]  ;;  %v479_v1 = vld [vmem:[%s702_s0 + $0x8] sm:$0xff]  ;;  %s444_s0 = smov 127   ;;  %s445_s18 = smov 1   ;;  %165 = vmatprep.mubr.f32.mxu0 %v446_v17  ;;  %325 = vmatprep.mubr.f32.mxu1 %v446_v17 }
   0x2   :  { %35 = vrot.lane.b32.xlu1 %v470_v0, %s442_s14  ;;  %29 = vrot.lane.b32.xlu0 %v470_v0, %s443_s15  ;;  %v485_v3 = vand.u32 127, %v16_v2  ;;  %v413_v13 = vpack.i.bf16 %v479_v1, %v470_v0 }
   0x4   :  { %vm39_vm0 = vcmp.lt.s32.totalorder %v485_v3, 112  ;;  %vm21_vm1 = vcmp.lt.s32.totalorder %v485_v3, 16  ;;  %v505_v14 = vadd.s32 128, %v485_v3  ;;  %v19_v19 = vand.u32 15, %v485_v3 }
   0x5   :  { %vm50_vm3 = vcmp.lt.s32.totalorder %v485_v3, 1  ;;  %vm57_vm4 = vcmp.lt.s32.totalorder %v485_v3, 127  ;;  %v257_v3 = vld [vmem:[%s704_s2] sm:$0xff] }
   0x6   :  { %37 = vrot.lane.b32.xlu1 %v479_v1, %s442_s14  ;;  %31 = vrot.lane.b32.xlu0 %v479_v1, %s443_s15  ;;  %vm24_vm2 = vcmp.ge.s32.totalorder %v505_v14, 240  ;;  %v20_v18 = vand.u32 15, %v505_v14  ;;  %vm532_vm6 = vcmp.eq.s32.totalorder %v19_v19, 0  ;;  %vm552_vm8 = vcmp.eq.s32.totalorder %v19_v19, 15 }
   0x8   :  { %vm528_vm5 = vcmp.eq.s32.totalorder %v20_v18, 0  ;;  %vm544_vm7 = vcmp.eq.s32.totalorder %v20_v18, 15 }
  0x74   :  { %v36_v4 = vpop.permute.xlu1 %35  ;;  %v30_v5 = vpop.permute.xlu0 %29 }
  0x78   :  { %v38_v6 = vpop.permute.xlu1 %37  ;;  %v32_v7 = vpop.permute.xlu0 %31 }
  0x79   :  { %v491_v8 = vsel %vm39_vm0, %v36_v4, %v38_v6  ;;  %v33_v9 = vsel %vm21_vm1, %v30_v5, %v32_v7  ;;  %v34_v10 = vsel %vm21_vm1, %v32_v7, %v30_v5  ;;  %v41_v15 = vsel %vm39_vm0, %v38_v6, %v36_v4 }
  0x7a   :  { %v42_v11 = vsel %vm21_vm1, %v491_v8, %v34_v10  ;;  %v514_v16 = vsel %vm24_vm2, %v33_v9, %v41_v15 }
  0x7b   :  { %v408_v12 = vpack.i.bf16 %v33_v9, %v42_v11 }
  0x7d   :  { %409 = vrot.lane.b32.xlu1 %v408_v12, %s444_s0  ;;  %399 = vrot.lane.b32.xlu0 %v408_v12, %s445_s18 }
  0x81   :  { %414 = vrot.lane.b32.xlu1 %v413_v13, %s444_s0  ;;  %404 = vrot.lane.b32.xlu0 %v413_v13, %s445_s18 }
  0x85   :  { %80 = vrot.lane.b32.xlu0 %v491_v8, %s445_s18  ;;  %82 = vrot.lane.b32.xlu1 %v514_v16, %s445_s18 }
  0x89   :  { %86 = vrot.lane.b32.xlu0 %v491_v8, %s444_s0  ;;  %88 = vrot.lane.b32.xlu1 %v514_v16, %s444_s0 }
  0xef   :  { %v410_v20 = vpop.permute.xlu1 %409  ;;  %v400_v21 = vpop.permute.xlu0 %399 }
  0xf0   :  { %v412_v24 = vunpack.i.h.bf16 %v410_v20  ;;  %v411_v25 = vunpack.i.l.bf16 %v410_v20  ;;  %v402_v26 = vunpack.i.h.bf16 %v400_v21  ;;  %v401_v27 = vunpack.i.l.bf16 %v400_v21 }
  0xf2   :  { %v51_v28 = vsel %vm50_vm3, %v401_v27, %v402_v26  ;;  %v59_v29 = vsel %vm57_vm4, %v412_v24, %v411_v25  ;;  %v52_v30 = vsel %vm50_vm3, %v402_v26, %v401_v27  ;;  %v58_v31 = vsel %vm57_vm4, %v411_v25, %v412_v24 }
  0xf3   :  { %v415_v33 = vpop.permute.xlu1 %414  ;;  %v405_v34 = vpop.permute.xlu0 %404  ;;  %v61_v35 = vsel %vm528_vm5, %v59_v29, %v51_v28  ;;  %v60_v36 = vsel %vm532_vm6, %v58_v31, %v52_v30  ;;  %v63_v50 = vsel %vm544_vm7, %v51_v28, %v59_v29  ;;  %v62_v52 = vsel %vm552_vm8, %v52_v30, %v58_v31 }
  0xf4   :  { %v417_v38 = vunpack.i.h.bf16 %v415_v33  ;;  %v416_v39 = vunpack.i.l.bf16 %v415_v33  ;;  %v407_v40 = vunpack.i.h.bf16 %v405_v34  ;;  %v406_v41 = vunpack.i.l.bf16 %v405_v34 }
  0xf5   :  { %v361_v42 = vpack.c.bf16 %v33_v9, %v61_v35  ;;  %v363_v43 = vpack.c.bf16 %v42_v11, %v60_v36  ;;  %v96_v11 = vld [vmem:[%s703_s1] sm:$0xff] }
  0xf6   :  { %v74_v44 = vsel %vm57_vm4, %v416_v39, %v417_v38  ;;  %v75_v45 = vsel %vm57_vm4, %v417_v38, %v416_v39  ;;  %v68_v46 = vsel %vm50_vm3, %v406_v41, %v407_v40  ;;  %v69_v47 = vsel %vm50_vm3, %v407_v40, %v406_v41 }
  0xf7   :  { %362 = vmatprep.subr.bf16.mxu0 %v361_v42  ;;  %v81_v48 = vpop.permute.xlu0 %80  ;;  %v83_v49 = vpop.permute.xlu1 %82  ;;  %v77_v51 = vsel %vm528_vm5, %v75_v45, %v68_v46  ;;  %v76_v53 = vsel %vm532_vm6, %v74_v44, %v69_v47  ;;  %v79_v56 = vsel %vm544_vm7, %v68_v46, %v75_v45  ;;  %v78_v60 = vsel %vm552_vm8, %v69_v47, %v74_v44 }
  0xf8   :  { %364 = vmatpush1.bf16.msra.mxu0 %v363_v43  ;;  %v365_v54 = vpack.c.bf16 %v77_v51, %v63_v50  ;;  %v367_v55 = vpack.c.bf16 %v76_v53, %v62_v52  ;;  %v369_v59 = vpack.c.bf16 %v79_v56, %v479_v1  ;;  %v84_v61 = vsel %vm50_vm3, %v81_v48, %v83_v49 }
  0xf9   :  { %v85_v4 = vsel %vm50_vm3, %v83_v49, %v81_v48  ;;  %v371_v5 = vpack.c.bf16 %v78_v60, %v470_v0 }
  0xfa   :  { %366 = vmatprep.subr.bf16.mxu0 %v365_v54 }
  0xfb   :  { %v87_v57 = vpop.permute.xlu0 %86  ;;  %v89_v58 = vpop.permute.xlu1 %88 }
  0xfc   :  { %368 = vmatpush1.bf16.msra.mxu0 %v367_v55  ;;  %v90_v62 = vsel %vm57_vm4, %v87_v57, %v89_v58  ;;  %v91_v63 = vsel %vm57_vm4, %v89_v58, %v87_v57 }
  0xfd   :  { %v93_v2 = vsel %vm528_vm5, %v91_v63, %v84_v61  ;;  %370 = vmatprep.subr.bf16.mxu0 %v369_v59  ;;  %v92_v7 = vsel %vm532_vm6, %v90_v62, %v85_v4  ;;  %v95_v10 = vsel %vm544_vm7, %v84_v61, %v91_v63  ;;  %v94_v12 = vsel %vm552_vm8, %v85_v4, %v90_v62 }
  0xfe   :  { %v373_v6 = vpack.c.bf16 %v514_v16, %v93_v2  ;;  %v375_v9 = vpack.c.bf16 %v491_v8, %v92_v7 }
 0x100   :  { %372 = vmatpush1.bf16.msra.mxu0 %v371_v5 }
 0x101   :  { %374 = vmatprep.subr.bf16.mxu0 %v373_v6 }
 0x104   :  { %376 = vmatpush1.bf16.msra.mxu0 %v375_v9 }
 0x105   :  { %117 = vmatprep.subr.mxu0 %v95_v10 }
 0x108   :  { %118 = vmatpush1.msra.mxu0 %v94_v12 }
 0x109   :  { %359 = vmatmul.mubr.msk.f32.vlgmr.msra.gmra.mrb[0].mxu0 %vm97_vm9, %v96_v11 }
 0x1dc   :  { %v167_v13 = vpop.f32.mrb[0].mxu0 }
 0x1dd   :  { %v169_v15 = vpop.f32.mrb[1].mxu0  ;;  %v175_v16 = vmul.f32 %v167_v13, %v167_v13 }
 0x1de   :  { %v176_v8 = vmul.f32 %v169_v15, %v169_v15  ;;  %v172_v17 = vadd.f32 %v169_v15, %v167_v13 }
 0x1e0   :  { %173 = vadd.xlane.f32.xlu0 %v172_v17  ;;  %v177_v18 = vadd.f32 %v176_v8, %v175_v16 }
 0x1e2   :  { %178 = vadd.xlane.f32.xlu1 %v177_v18 }
 0x26d   :  { %v174_v19 = vpop.xlane.xlu0 %173 }
 0x26e   :  { %v180_v20 = vmul.f32 0.00390625, %v174_v19 }
 0x26f   :  { %v179_v21 = vpop.xlane.xlu1 %178 }
 0x270   :  { %v181_v24 = vmul.f32 0.00390625, %v179_v21  ;;  %v182_v25 = vmul.f32 %v180_v20, %v180_v20  ;;  %v185_v29 = vsub.f32 %v167_v13, %v180_v20  ;;  %v186_v30 = vsub.f32 %v169_v15, %v180_v20 }
 0x272   :  { %v183_v26 = vsub.f32 %v181_v24, %v182_v25 }
 0x274   :  { %v184_v27 = vmax.f32 %v183_v26, 0.0 }
 0x276   :  { %v187_v28 = vadd.f32 1e-05, %v184_v27 }
 0x278   :  { %438 = vrsqrt.f32 %v187_v28 }
 0x282   :  { %v439_v31 = vpop.eup %438 }
 0x283   :  { %v190_v33 = vmul.f32 %v439_v31, %v186_v30  ;;  %v189_v34 = vmul.f32 %v439_v31, %v185_v29 }
 0x285   :  { %v600_v35 = vmax.f32 %v190_v33, 0.0  ;;  %v602_v36 = vmax.f32 %v189_v34, 0.0 }
 0x287   :  { %195 = vrot.lane.b32.xlu1 %v600_v35, %s443_s15  ;;  %193 = vrot.lane.b32.xlu0 %v602_v36, %s443_s15  ;;  %v433_v47 = vpack.i.bf16 %v600_v35, %v602_v36 }
 0x28b   :  { %201 = vrot.lane.b32.xlu1 %v600_v35, %s442_s14  ;;  %199 = vrot.lane.b32.xlu0 %v602_v36, %s442_s14 }
 0x2f9   :  { %v196_v38 = vpop.permute.xlu1 %195  ;;  %v194_v39 = vpop.permute.xlu0 %193 }
 0x2fa   :  { %v198_v42 = vsel %vm21_vm1, %v196_v38, %v194_v39  ;;  %v197_v44 = vsel %vm21_vm1, %v194_v39, %v196_v38 }
 0x2fd   :  { %v202_v40 = vpop.permute.xlu1 %201  ;;  %v200_v41 = vpop.permute.xlu0 %199 }
 0x2fe   :  { %v616_v43 = vsel %vm39_vm0, %v200_v41, %v202_v40  ;;  %v204_v48 = vsel %vm39_vm0, %v202_v40, %v200_v41 }
 0x2ff   :  { %v205_v45 = vsel %vm21_vm1, %v616_v43, %v198_v42  ;;  %v208_v49 = vsel %vm24_vm2, %v197_v44, %v204_v48 }
 0x300   :  { %v428_v46 = vpack.i.bf16 %v197_v44, %v205_v45 }
 0x302   :  { %429 = vrot.lane.b32.xlu1 %v428_v46, %s444_s0  ;;  %419 = vrot.lane.b32.xlu0 %v428_v46, %s445_s18 }
 0x306   :  { %434 = vrot.lane.b32.xlu1 %v433_v47, %s444_s0  ;;  %424 = vrot.lane.b32.xlu0 %v433_v47, %s445_s18 }
 0x30a   :  { %243 = vrot.lane.b32.xlu1 %v208_v49, %s445_s18  ;;  %241 = vrot.lane.b32.xlu0 %v616_v43, %s445_s18 }
 0x30e   :  { %249 = vrot.lane.b32.xlu1 %v208_v49, %s444_s0  ;;  %247 = vrot.lane.b32.xlu0 %v616_v43, %s444_s0 }
 0x374   :  { %v430_v50 = vpop.permute.xlu1 %429  ;;  %v420_v51 = vpop.permute.xlu0 %419 }
 0x375   :  { %v432_v52 = vunpack.i.h.bf16 %v430_v50  ;;  %v431_v53 = vunpack.i.l.bf16 %v430_v50  ;;  %v422_v54 = vunpack.i.h.bf16 %v420_v51  ;;  %v421_v55 = vunpack.i.l.bf16 %v420_v51 }
 0x377   :  { %v213_v14 = vsel %vm50_vm3, %v421_v55, %v422_v54  ;;  %v220_v56 = vsel %vm57_vm4, %v432_v52, %v431_v53  ;;  %v214_v57 = vsel %vm50_vm3, %v422_v54, %v421_v55  ;;  %v219_v58 = vsel %vm57_vm4, %v431_v53, %v432_v52 }
 0x378   :  { %v435_v59 = vpop.permute.xlu1 %434  ;;  %v425_v60 = vpop.permute.xlu0 %424  ;;  %v222_v61 = vsel %vm528_vm5, %v220_v56, %v213_v14  ;;  %v221_v62 = vsel %vm532_vm6, %v219_v58, %v214_v57  ;;  %v224_v16 = vsel %vm544_vm7, %v213_v14, %v220_v56  ;;  %v223_v17 = vsel %vm552_vm8, %v214_v57, %v219_v58 }
 0x379   :  { %v437_v63 = vunpack.i.h.bf16 %v435_v59  ;;  %v436_v2 = vunpack.i.l.bf16 %v435_v59  ;;  %v427_v4 = vunpack.i.h.bf16 %v425_v60  ;;  %v426_v5 = vunpack.i.l.bf16 %v425_v60 }
 0x37a   :  { %v377_v6 = vpack.c.bf16 %v197_v44, %v222_v61  ;;  %v379_v7 = vpack.c.bf16 %v205_v45, %v221_v62 }
 0x37b   :  { %v235_v9 = vsel %vm57_vm4, %v436_v2, %v437_v63  ;;  %v236_v10 = vsel %vm57_vm4, %v437_v63, %v436_v2  ;;  %v229_v11 = vsel %vm50_vm3, %v426_v5, %v427_v4  ;;  %v230_v12 = vsel %vm50_vm3, %v427_v4, %v426_v5 }
 0x37c   :  { %378 = vmatprep.subr.bf16.mxu1 %v377_v6  ;;  %v244_v13 = vpop.permute.xlu1 %243  ;;  %v242_v15 = vpop.permute.xlu0 %241  ;;  %v238_v8 = vsel %vm528_vm5, %v236_v10, %v229_v11  ;;  %v237_v18 = vsel %vm532_vm6, %v235_v9, %v230_v12  ;;  %v240_v21 = vsel %vm544_vm7, %v229_v11, %v236_v10  ;;  %v239_v27 = vsel %vm552_vm8, %v230_v12, %v235_v9 }
 0x37d   :  { %380 = vmatpush1.bf16.msra.mxu1 %v379_v7  ;;  %v381_v19 = vpack.c.bf16 %v238_v8, %v224_v16  ;;  %v383_v20 = vpack.c.bf16 %v237_v18, %v223_v17  ;;  %v385_v26 = vpack.c.bf16 %v240_v21, %v600_v35  ;;  %v245_v28 = vsel %vm50_vm3, %v242_v15, %v244_v13 }
 0x37e   :  { %v246_v33 = vsel %vm50_vm3, %v244_v13, %v242_v15  ;;  %v387_v34 = vpack.c.bf16 %v239_v27, %v602_v36 }
 0x37f   :  { %382 = vmatprep.subr.bf16.mxu1 %v381_v19 }
 0x380   :  { %v250_v24 = vpop.permute.xlu1 %249  ;;  %v248_v25 = vpop.permute.xlu0 %247 }
 0x381   :  { %v251_v29 = vsel %vm57_vm4, %v248_v25, %v250_v24  ;;  %v252_v30 = vsel %vm57_vm4, %v250_v24, %v248_v25  ;;  %384 = vmatpush1.bf16.msra.mxu1 %v383_v20 }
 0x382   :  { %v254_v31 = vsel %vm528_vm5, %v252_v30, %v245_v28  ;;  %386 = vmatprep.subr.bf16.mxu1 %v385_v26  ;;  %v253_v38 = vsel %vm532_vm6, %v251_v29, %v246_v33  ;;  %v256_v40 = vsel %vm544_vm7, %v245_v28, %v252_v30  ;;  %v255_v22 = vsel %vm552_vm8, %v246_v33, %v251_v29 }
 0x383   :  { %v389_v35 = vpack.c.bf16 %v208_v49, %v254_v31  ;;  %v391_v39 = vpack.c.bf16 %v616_v43, %v253_v38 }
 0x385   :  { %388 = vmatpush1.bf16.msra.mxu1 %v387_v34 }
 0x386   :  { %390 = vmatprep.subr.bf16.mxu1 %v389_v35 }
 0x389   :  { %392 = vmatpush1.bf16.msra.mxu1 %v391_v39 }
 0x38a   :  { %277 = vmatprep.subr.mxu1 %v256_v40 }
 0x38d   :  { %278 = vmatpush1.msra.mxu1 %v255_v22 }
 0x38e   :  { %360 = vmatmul.mubr.msk.f32.vlgmr.msra.gmra.mrb[0].mxu1 %vm97_vm9, %v257_v3 }
 0x461   :  { %v327_v23 = vpop.f32.mrb[0].mxu1 }
 0x462   :  { %v329_v36 = vpop.f32.mrb[1].mxu1  ;;  %v335_v41 = vmul.f32 %v327_v23, %v327_v23 }
 0x463   :  { %v336_v42 = vmul.f32 %v329_v36, %v329_v36  ;;  %v332_v43 = vadd.f32 %v329_v36, %v327_v23 }
 0x465   :  { %333 = vadd.xlane.f32.xlu0 %v332_v43  ;;  %v337_v44 = vadd.f32 %v336_v42, %v335_v41 }
 0x467   :  { %338 = vadd.xlane.f32.xlu1 %v337_v44 }
 0x4f2   :  { %v334_v32 = vpop.xlane.xlu0 %333 }
 0x4f3   :  { %v340_v45 = vmul.f32 0.00390625, %v334_v32 }
 0x4f4   :  { %v339_v46 = vpop.xlane.xlu1 %338 }
 0x4f5   :  { %v341_v47 = vmul.f32 0.00390625, %v339_v46  ;;  %v342_v48 = vmul.f32 %v340_v45, %v340_v45  ;;  %v345_v51 = vsub.f32 %v327_v23, %v340_v45  ;;  %v346_v52 = vsub.f32 %v329_v36, %v340_v45 }
 0x4f7   :  { %v343_v49 = vsub.f32 %v341_v47, %v342_v48 }
 0x4f9   :  { %v344_v50 = vmax.f32 %v343_v49, 0.0 }
 0x4fb   :  { %v347_v37 = vadd.f32 1e-05, %v344_v50 }
 0x4fd   :  { %440 = vrsqrt.f32 %v347_v37 }
 0x507   :  { %v441_v53 = vpop.eup %440 }
 0x508   :  { %v349_v54 = vmul.f32 %v441_v53, %v345_v51  ;;  %v350_v55 = vmul.f32 %v441_v53, %v346_v52 }
 0x50a   :  { %v351_v14 = vadd.f32 %v349_v54, %v470_v0  ;;  %v352_v56 = vadd.f32 %v350_v55, %v479_v1 }
 0x50c   :  { %353 = vst [vmem:[%s705_s3] sm:$0xff] %v351_v14  ;;  %354 = vst [vmem:[%s705_s3 + $0x8] sm:$0xff] %v352_v56 }

</bundles_post_ra>
